<compile_context>
chip_gen: v7x
topology: tpu7x:2x2x1
jax: 0.10.0
libtpu: 0.0.40
codegen_flags: <defaults>
</compile_context>

<pallas_src>
import jax
import jax.numpy as jnp
from jax.experimental import pallas as pl
from jax.experimental.pallas import tpu as pltpu

L = 8                          # sequence length implied by fc = Linear(64*8 + 128, 128)
C1 = 32                        # conv1 out channels
C2 = 64                        # conv2 out channels
DNN_H1 = 64
DNN_H1_PAD = 128               # lane-padded width of the DNN hidden-1 block
DNN_H2 = 128
FC_OUT = 128
CNN_FLAT = C2 * L              # 512
FUSED_IN = 2 * L               # 16  = [cnn(8) | dnn(8)]
FUSED_H1 = C1 * L + DNN_H1_PAD # 384 = [conv1 flat (256) | dnn hidden1 padded (128)]

TB_MAX = 1024
# Fixed tile buckets: keeps compiled shapes on a small, sublane/lane-friendly
# set (<=12.5% padding waste in the worst case) and avoids per-batch-size
# Mosaic recompiles in serving.
_TB_BUCKETS = (16, 32, 64, 128, 256, 384, 512, 640, 768, 896, 1024)


def _cdiv(a, b):
    return (a + b - 1) // b


def _round_up(x, m):
    return ((x + m - 1) // m) * m


def _bucket_tb(tb):
    for b in _TB_BUCKETS:
        if tb <= b:
            return b
    return _TB_BUCKETS[-1]


# --------------------------------------------------------------------------
# Pallas kernel: whole hot path (4 MXU passes + biases + ReLUs + fc-merge)
# --------------------------------------------------------------------------
def _hybrid_kernel(x_ref, w0_ref, b0_ref, m2_ref, b2_ref,
                   wd2_ref, bd2_ref, wfc_ref, wfd_ref, bf_ref, out_ref):
    # Fused first layer: block-diag [conv1-band | Linear(8->64, lane-padded)]
    # on the (TB, 16) bf16 input.
    x = x_ref[...]                                                       # (TB, 16) bf16
    h = jnp.dot(x, w0_ref[...], preferred_element_type=jnp.float32)      # (TB, 384) f32
    h = jnp.maximum(h + b0_ref[...], 0.0)
    h1 = h[:, :C1 * L].astype(jnp.bfloat16)        # conv1 out, channel-major (TB, 256)
    d1 = h[:, C1 * L:].astype(jnp.bfloat16)        # dnn hidden1, lane-padded (TB, 128)

    # conv2 as banded matmul + ReLU (output layout == torch Flatten order).
    h2 = jnp.maximum(
        jnp.dot(h1, m2_ref[...], preferred_element_type=jnp.float32)
        + b2_ref[...], 0.0)                                              # (TB, 512)
    # dnn Linear(64->128) + ReLU (K lane-padded to 128, pad rows of Wd2 are 0).
    d2 = jnp.maximum(
        jnp.dot(d1, wd2_ref[...], preferred_element_type=jnp.float32)
        + bd2_ref[...], 0.0)                                             # (TB, 128)

    # fc over concat([cnn, dnn]) split into two matmuls (no in-kernel concat,
    # FLOP-neutral; second dot accumulates cheaply).
    out_ref[...] = (
        jnp.dot(h2.astype(jnp.bfloat16), wfc_ref[...],
                preferred_element_type=jnp.float32)
        + jnp.dot(d2.astype(jnp.bfloat16), wfd_ref[...],
                  preferred_element_type=jnp.float32)
        + bf_ref[...])                                                   # (TB, 128) f32


# --------------------------------------------------------------------------
# One-time weight prep (plain JAX, hoisted out of the forward path).
# Turn a torch-style Conv1d weight (Cout, Cin, 3) into a band matrix
# M of shape (Cin*L, Cout*L) so that conv == x_flat @ M (channel-major flat).
# --------------------------------------------------------------------------
def make_band_matrix(w, length):
    co, ci, K = w.shape
    tp = jnp.arange(length)[:, None]           # input position t'
    t = jnp.arange(length)[None, :]            # output position t
    k = tp - t + 1                             # kernel tap (padding=1)
    valid = (k >= 0) & (k < K)
    kc = jnp.clip(k, 0, K - 1)
    band = w[:, :, kc]                         # (Cout, Cin, L, L)
    band = band * valid[None, None].astype(w.dtype)
    # rows: ci*L + t', cols: co*L + t
    return jnp.transpose(band, (1, 2, 0, 3)).reshape(ci * length, co * length)


def prepare_params(p):
    """Pre-lower torch-style params -> kernel-ready (bf16 weights, f32 biases)."""
    M1 = make_band_matrix(p["w1"], L)                          # (8,   256)
    Wd1 = p["wd1"].T                                           # (8,   64)
    # Block-diagonal fused layer-1 weight, DNN block lane-padded 64 -> 128.
    W0 = jnp.zeros((FUSED_IN, FUSED_H1), jnp.float32)
    W0 = W0.at[:L, :C1 * L].set(M1)
    W0 = W0.at[L:, C1 * L:C1 * L + DNN_H1].set(Wd1)
    b0 = jnp.zeros((1, FUSED_H1), jnp.float32)
    b0 = b0.at[0, :C1 * L].set(jnp.repeat(p["b1"], L))
    b0 = b0.at[0, C1 * L:C1 * L + DNN_H1].set(p["bd1"])        # pad cols stay 0 -> ReLU 0

    M2 = make_band_matrix(p["w2"], L)                          # (256, 512)
    b2 = jnp.repeat(p["b2"], L)[None, :]                       # (1,   512)

    # Linear(64->128) weight, K lane-padded to 128 (pad rows zero).
    Wd2 = jnp.zeros((DNN_H1_PAD, DNN_H2), jnp.float32)
    Wd2 = Wd2.at[:DNN_H1].set(p["wd2"].T)
    bd2 = p["bd2"][None, :]                                    # (1,   128)

    Wfc = p["wf"][:, :CNN_FLAT].T                              # (512, 128)
    Wfd = p["wf"][:, CNN_FLAT:].T                              # (128, 128)
    bf = p["bf"][None, :]                                      # (1,   128)

    bf16 = lambda a: a.astype(jnp.bfloat16)
    f32 = lambda a: a.astype(jnp.float32)
    return {
        "w0": bf16(W0), "b0": f32(b0),
        "m2": bf16(M2), "b2": f32(b2),
        "wd2": bf16(Wd2), "bd2": f32(bd2),
        "wfc": bf16(Wfc), "wfd": bf16(Wfd), "bf": f32(bf),
    }


# --------------------------------------------------------------------------
# Forward wrapper: batch-gridded pallas_call.
# --------------------------------------------------------------------------
@jax.jit
def hybrid_forward(cnn_input, dnn_input, prep):
    B = cnn_input.shape[0]
    assert cnn_input.shape[1] == 1, "kernel lowering assumes Conv1d in_channels == 1"

    # >=2 steps so the batch axis can shard across v7x's two TensorCores;
    # TB derived from the actual batch (no rounding up to a full 1024 tile),
    # multiple of 16 for bf16 sublane packing, bucketed to avoid recompiles.
    n_steps = max(2, _cdiv(B, TB_MAX))
    TB = _bucket_tb(_round_up(_cdiv(B, n_steps), 16))
    Bp = n_steps * TB

    xc = cnn_input.reshape(B, L)                  # squeeze in_channels=1 (NCW layout)
    xd = dnn_input.reshape(B, L)
    x = jnp.concatenate([xc, xd], axis=1).astype(jnp.bfloat16)   # (B, 16)
    if Bp != B:
        x = jnp.pad(x, ((0, Bp - B), (0, 0)))

    weight_args = (prep["w0"], prep["b0"], prep["m2"], prep["b2"],
                   prep["wd2"], prep["bd2"], prep["wfc"], prep["wfd"], prep["bf"])
    # Weights/biases: constant index_map -> DMA'd once, VMEM-resident across steps.
    weight_specs = [pl.BlockSpec(a.shape, lambda i: (0, 0)) for a in weight_args]

    w_bytes = sum(int(a.size) * a.dtype.itemsize for a in weight_args)
    flops = 2 * Bp * (FUSED_IN * FUSED_H1 + C1 * L * CNN_FLAT
                      + DNN_H1_PAD * DNN_H2 + CNN_FLAT * FC_OUT + DNN_H2 * FC_OUT)
    cost = pl.CostEstimate(
        flops=flops, transcendentals=0,
        bytes_accessed=Bp * FUSED_IN * 2 + Bp * FC_OUT * 4 + w_bytes)

    out = pl.pallas_call(
        _hybrid_kernel,
        out_shape=jax.ShapeDtypeStruct((Bp, FC_OUT), jnp.float32),
        grid=(n_steps,),
        in_specs=[pl.BlockSpec((TB, FUSED_IN), lambda i: (i, 0))] + weight_specs,
        out_specs=pl.BlockSpec((TB, FC_OUT), lambda i: (i, 0)),
        compiler_params=pltpu.CompilerParams(
            dimension_semantics=("parallel",)),   # shards batch steps across v7x's 2 TCs
        cost_estimate=cost,
    )(x, *weight_args)
    return out[:B]


# --------------------------------------------------------------------------
# Pure-JAX f32 reference (direct conv via shifted slices) for verification.
# --------------------------------------------------------------------------
def _conv1d_ref(x, w, b):
    Bx, Ci, Lx = x.shape
    K = w.shape[-1]
    xp = jnp.pad(x, ((0, 0), (0, 0), (1, 1)))
    out = jnp.broadcast_to(b[None, :, None], (Bx, w.shape[0], Lx))
    for k in range(K):
        out = out + jnp.einsum("bct,oc->bot", xp[:, :, k:k + Lx], w[:, :, k])
    return out


def reference(cnn_input, dnn_input, p):
    B = cnn_input.shape[0]
    h1 = jax.nn.relu(_conv1d_ref(cnn_input, p["w1"], p["b1"]))
    h2 = jax.nn.relu(_conv1d_ref(h1, p["w2"], p["b2"]))
    cnn_out = h2.reshape(B, -1)
    d1 = jax.nn.relu(dnn_input @ p["wd1"].T + p["bd1"])
    d2 = jax.nn.relu(d1 @ p["wd2"].T + p["bd2"])
    combined = jnp.concatenate([cnn_out, d2], axis=1)
    return combined @ p["wf"].T + p["bf"]


if __name__ == "__main__":
    key = jax.random.PRNGKey(0)
    ks = jax.random.split(key, 12)
    s = 0.1
    params = {
        "w1": s * jax.random.normal(ks[0], (C1, 1, 3), jnp.float32),
        "b1": s * jax.random.normal(ks[1], (C1,), jnp.float32),
        "w2": s * jax.random.normal(ks[2], (C2, C1, 3), jnp.float32),
        "b2": s * jax.random.normal(ks[3], (C2,), jnp.float32),
        "wd1": s * jax.random.normal(ks[4], (DNN_H1, L), jnp.float32),
        "bd1": s * jax.random.normal(ks[5], (DNN_H1,), jnp.float32),
        "wd2": s * jax.random.normal(ks[6], (DNN_H2, DNN_H1), jnp.float32),
        "bd2": s * jax.random.normal(ks[7], (DNN_H2,), jnp.float32),
        "wf": s * jax.random.normal(ks[8], (FC_OUT, CNN_FLAT + DNN_H2), jnp.float32),
        "bf": s * jax.random.normal(ks[9], (FC_OUT,), jnp.float32),
    }

    B = 2
    cnn_input = jax.random.normal(ks[10], (B, 1, L), jnp.float32)   # NCW, like torch
    dnn_input = jax.random.normal(ks[11], (B, L), jnp.float32)

    # One-time weight preprocessing (hoisted out of the per-forward path).
    prep = prepare_params(params)

    out = jax.block_until_ready(hybrid_forward(cnn_input, dnn_input, prep))
    ref = jax.block_until_ready(reference(cnn_input, dnn_input, params))

    assert out.shape == (B, FC_OUT), out.shape
    # bf16 matmul operands bound accuracy to roughly this tolerance; keep the
    # first layer in f32 if tighter accuracy is needed for deployment.
    assert jnp.allclose(out, ref, rtol=5e-2, atol=5e-2), float(jnp.max(jnp.abs(out - ref)))
    print("KERNEL_OK")
</pallas_src>

<mosaic_0001>
module attributes {stable_mosaic.version = 11 : i64} {
  func.func @_hybrid_kernel(%arg0: i32, %arg1: memref<16x16xbf16, #tpu.memory_space<vmem>>, %arg2: memref<16x384xbf16, #tpu.memory_space<vmem>>, %arg3: memref<1x384xf32, #tpu.memory_space<vmem>>, %arg4: memref<256x512xbf16, #tpu.memory_space<vmem>>, %arg5: memref<1x512xf32, #tpu.memory_space<vmem>>, %arg6: memref<128x128xbf16, #tpu.memory_space<vmem>>, %arg7: memref<1x128xf32, #tpu.memory_space<vmem>>, %arg8: memref<512x128xbf16, #tpu.memory_space<vmem>>, %arg9: memref<128x128xbf16, #tpu.memory_space<vmem>>, %arg10: memref<1x128xf32, #tpu.memory_space<vmem>>, %arg11: memref<16x128xf32, #tpu.memory_space<vmem>>) attributes {dimension_semantics = [#tpu.dimension_semantics<parallel>], iteration_bounds = array<i64: 2>, scalar_prefetch = 0 : i64, scratch_operands = 0 : i64, tpu.core_type = #tpu.core_type<tc>, window_params = [{transform_indices = @transform_0, window_bounds = array<i64: 16, 16>}, {pipeline_mode = #tpu.pipeline_mode<synchronous>, transform_indices = @transform_1, window_bounds = array<i64: 16, 384>}, {pipeline_mode = #tpu.pipeline_mode<synchronous>, transform_indices = @transform_2, window_bounds = array<i64: 1, 384>}, {pipeline_mode = #tpu.pipeline_mode<synchronous>, transform_indices = @transform_3, window_bounds = array<i64: 256, 512>}, {pipeline_mode = #tpu.pipeline_mode<synchronous>, transform_indices = @transform_4, window_bounds = array<i64: 1, 512>}, {pipeline_mode = #tpu.pipeline_mode<synchronous>, transform_indices = @transform_5, window_bounds = array<i64: 128, 128>}, {pipeline_mode = #tpu.pipeline_mode<synchronous>, transform_indices = @transform_6, window_bounds = array<i64: 1, 128>}, {pipeline_mode = #tpu.pipeline_mode<synchronous>, transform_indices = @transform_7, window_bounds = array<i64: 512, 128>}, {pipeline_mode = #tpu.pipeline_mode<synchronous>, transform_indices = @transform_8, window_bounds = array<i64: 128, 128>}, {pipeline_mode = #tpu.pipeline_mode<synchronous>, transform_indices = @transform_9, window_bounds = array<i64: 1, 128>}, {transform_indices = @transform_10, window_bounds = array<i64: 16, 128>}]} {
    %c0 = arith.constant 0 : index
    %c0_0 = arith.constant 0 : index
    %0 = vector.load %arg1[%c0, %c0_0] : memref<16x16xbf16, #tpu.memory_space<vmem>>, vector<16x16xbf16>
    %c0_1 = arith.constant 0 : index
    %c0_2 = arith.constant 0 : index
    %1 = vector.load %arg2[%c0_1, %c0_2] : memref<16x384xbf16, #tpu.memory_space<vmem>>, vector<16x384xbf16>
    %cst = arith.constant dense<0.000000e+00> : vector<16x384xf32>
    %2 = tpu.matmul %0, %1, %cst {dimension_numbers = #tpu.dot_dimension_numbers<[1], [0], [0], [1], [0, 0, 1, 1], [], []>} : vector<16x16xbf16>, vector<16x384xbf16>, vector<16x384xf32> -> vector<16x384xf32>
    %c0_3 = arith.constant 0 : index
    %c0_4 = arith.constant 0 : index
    %3 = vector.load %arg3[%c0_3, %c0_4] : memref<1x384xf32, #tpu.memory_space<vmem>>, vector<1x384xf32>
    %4 = vector.broadcast %3 : vector<1x384xf32> to vector<16x384xf32>
    %5 = arith.addf %2, %4 : vector<16x384xf32>
    %cst_5 = arith.constant 0.000000e+00 : f32
    %6 = vector.broadcast %cst_5 : f32 to vector<16x384xf32>
    %7 = arith.maximumf %5, %6 : vector<16x384xf32>
    %8 = vector.extract_strided_slice %7 {offsets = [0, 0], sizes = [16, 256], strides = [1, 1]} : vector<16x384xf32> to vector<16x256xf32>
    %9 = arith.truncf %8 : vector<16x256xf32> to vector<16x256xbf16>
    %10 = vector.extract_strided_slice %7 {offsets = [0, 256], sizes = [16, 128], strides = [1, 1]} : vector<16x384xf32> to vector<16x128xf32>
    %11 = arith.truncf %10 : vector<16x128xf32> to vector<16x128xbf16>
    %c0_6 = arith.constant 0 : index
    %c0_7 = arith.constant 0 : index
    %12 = vector.load %arg4[%c0_6, %c0_7] : memref<256x512xbf16, #tpu.memory_space<vmem>>, vector<256x512xbf16>
    %cst_8 = arith.constant dense<0.000000e+00> : vector<16x512xf32>
    %13 = tpu.matmul %9, %12, %cst_8 {dimension_numbers = #tpu.dot_dimension_numbers<[1], [0], [0], [1], [0, 0, 1, 1], [], []>} : vector<16x256xbf16>, vector<256x512xbf16>, vector<16x512xf32> -> vector<16x512xf32>
    %c0_9 = arith.constant 0 : index
    %c0_10 = arith.constant 0 : index
    %14 = vector.load %arg5[%c0_9, %c0_10] : memref<1x512xf32, #tpu.memory_space<vmem>>, vector<1x512xf32>
    %15 = vector.broadcast %14 : vector<1x512xf32> to vector<16x512xf32>
    %16 = arith.addf %13, %15 : vector<16x512xf32>
    %cst_11 = arith.constant 0.000000e+00 : f32
    %17 = vector.broadcast %cst_11 : f32 to vector<16x512xf32>
    %18 = arith.maximumf %16, %17 : vector<16x512xf32>
    %c0_12 = arith.constant 0 : index
    %c0_13 = arith.constant 0 : index
    %19 = vector.load %arg6[%c0_12, %c0_13] : memref<128x128xbf16, #tpu.memory_space<vmem>>, vector<128x128xbf16>
    %cst_14 = arith.constant dense<0.000000e+00> : vector<16x128xf32>
    %20 = tpu.matmul %11, %19, %cst_14 {dimension_numbers = #tpu.dot_dimension_numbers<[1], [0], [0], [1], [0, 0, 1, 1], [], []>} : vector<16x128xbf16>, vector<128x128xbf16>, vector<16x128xf32> -> vector<16x128xf32>
    %c0_15 = arith.constant 0 : index
    %c0_16 = arith.constant 0 : index
    %21 = vector.load %arg7[%c0_15, %c0_16] : memref<1x128xf32, #tpu.memory_space<vmem>>, vector<1x128xf32>
    %22 = vector.broadcast %21 : vector<1x128xf32> to vector<16x128xf32>
    %23 = arith.addf %20, %22 : vector<16x128xf32>
    %cst_17 = arith.constant 0.000000e+00 : f32
    %24 = vector.broadcast %cst_17 : f32 to vector<16x128xf32>
    %25 = arith.maximumf %23, %24 : vector<16x128xf32>
    %26 = arith.truncf %18 : vector<16x512xf32> to vector<16x512xbf16>
    %c0_18 = arith.constant 0 : index
    %c0_19 = arith.constant 0 : index
    %27 = vector.load %arg8[%c0_18, %c0_19] : memref<512x128xbf16, #tpu.memory_space<vmem>>, vector<512x128xbf16>
    %cst_20 = arith.constant dense<0.000000e+00> : vector<16x128xf32>
    %28 = tpu.matmul %26, %27, %cst_20 {dimension_numbers = #tpu.dot_dimension_numbers<[1], [0], [0], [1], [0, 0, 1, 1], [], []>} : vector<16x512xbf16>, vector<512x128xbf16>, vector<16x128xf32> -> vector<16x128xf32>
    %29 = arith.truncf %25 : vector<16x128xf32> to vector<16x128xbf16>
    %c0_21 = arith.constant 0 : index
    %c0_22 = arith.constant 0 : index
    %30 = vector.load %arg9[%c0_21, %c0_22] : memref<128x128xbf16, #tpu.memory_space<vmem>>, vector<128x128xbf16>
    %cst_23 = arith.constant dense<0.000000e+00> : vector<16x128xf32>
    %31 = tpu.matmul %29, %30, %cst_23 {dimension_numbers = #tpu.dot_dimension_numbers<[1], [0], [0], [1], [0, 0, 1, 1], [], []>} : vector<16x128xbf16>, vector<128x128xbf16>, vector<16x128xf32> -> vector<16x128xf32>
    %32 = arith.addf %28, %31 : vector<16x128xf32>
    %c0_24 = arith.constant 0 : index
    %c0_25 = arith.constant 0 : index
    %33 = vector.load %arg10[%c0_24, %c0_25] : memref<1x128xf32, #tpu.memory_space<vmem>>, vector<1x128xf32>
    %34 = vector.broadcast %33 : vector<1x128xf32> to vector<16x128xf32>
    %35 = arith.addf %32, %34 : vector<16x128xf32>
    %c0_26 = arith.constant 0 : index
    %c0_27 = arith.constant 0 : index
    %36 = vector.load %arg11[%c0_26, %c0_27] : memref<16x128xf32, #tpu.memory_space<vmem>>, vector<16x128xf32>
    tpu.vector_store %arg11[%c0_26, %c0_27], %35 {strides = array<i32>} : memref<16x128xf32, #tpu.memory_space<vmem>>, vector<16x128xf32>,
    return
  }
  func.func @transform_0(%arg0: i32) -> (i32, i32) {
    %c0_i32 = arith.constant 0 : i32
    %c0_i32_0 = arith.constant 0 : i32
    return %arg0, %c0_i32 : i32, i32
  }
  func.func @transform_1(%arg0: i32) -> (i32, i32) {
    %c0_i32 = arith.constant 0 : i32
    %c0_i32_0 = arith.constant 0 : i32
    %c0_i32_1 = arith.constant 0 : i32
    return %c0_i32, %c0_i32_0 : i32, i32
  }
  func.func @transform_2(%arg0: i32) -> (i32, i32) {
    %c0_i32 = arith.constant 0 : i32
    %c0_i32_0 = arith.constant 0 : i32
    %c0_i32_1 = arith.constant 0 : i32
    return %c0_i32, %c0_i32_0 : i32, i32
  }
  func.func @transform_3(%arg0: i32) -> (i32, i32) {
    %c0_i32 = arith.constant 0 : i32
    %c0_i32_0 = arith.constant 0 : i32
    %c0_i32_1 = arith.constant 0 : i32
    return %c0_i32, %c0_i32_0 : i32, i32
  }
  func.func @transform_4(%arg0: i32) -> (i32, i32) {
    %c0_i32 = arith.constant 0 : i32
    %c0_i32_0 = arith.constant 0 : i32
    %c0_i32_1 = arith.constant 0 : i32
    return %c0_i32, %c0_i32_0 : i32, i32
  }
  func.func @transform_5(%arg0: i32) -> (i32, i32) {
    %c0_i32 = arith.constant 0 : i32
    %c0_i32_0 = arith.constant 0 : i32
    %c0_i32_1 = arith.constant 0 : i32
    return %c0_i32, %c0_i32_0 : i32, i32
  }
  func.func @transform_6(%arg0: i32) -> (i32, i32) {
    %c0_i32 = arith.constant 0 : i32
    %c0_i32_0 = arith.constant 0 : i32
    %c0_i32_1 = arith.constant 0 : i32
    return %c0_i32, %c0_i32_0 : i32, i32
  }
  func.func @transform_7(%arg0: i32) -> (i32, i32) {
    %c0_i32 = arith.constant 0 : i32
    %c0_i32_0 = arith.constant 0 : i32
    %c0_i32_1 = arith.constant 0 : i32
    return %c0_i32, %c0_i32_0 : i32, i32
  }
  func.func @transform_8(%arg0: i32) -> (i32, i32) {
    %c0_i32 = arith.constant 0 : i32
    %c0_i32_0 = arith.constant 0 : i32
    %c0_i32_1 = arith.constant 0 : i32
    return %c0_i32, %c0_i32_0 : i32, i32
  }
  func.func @transform_9(%arg0: i32) -> (i32, i32) {
    %c0_i32 = arith.constant 0 : i32
    %c0_i32_0 = arith.constant 0 : i32
    %c0_i32_1 = arith.constant 0 : i32
    return %c0_i32, %c0_i32_0 : i32, i32
  }
  func.func @transform_10(%arg0: i32) -> (i32, i32) {
    %c0_i32 = arith.constant 0 : i32
    %c0_i32_0 = arith.constant 0 : i32
    return %arg0, %c0_i32 : i32, i32
  }
}

</mosaic_0001>

<bundles_post_ra>
// kernel: hybrid_forward.1
= control target key start
LH: loop header
LB: loop body
LE: loop exit
PB: predicated region body
PF: predicated region fallthrough
CT: control target
= control target key end

     0   :  { %s2858_s0 = inlined_call_operand.vmem [shape: bf16[32,16], index: 0, kind: input, shape index: {}]   ;;  %s2859_s1 = inlined_call_operand.hbm [shape: bf16[16,384], index: 1, kind: input, shape index: {}]   ;;  %s2860_s2 = inlined_call_operand.vmem [shape: f32[1,384], index: 2, kind: input, shape index: {}]   ;;  %s2861_s3 = inlined_call_operand.hbm [shape: bf16[256,512], index: 3, kind: input, shape index: {}]   ;;  %s2862_s4 = inlined_call_operand.hbm [shape: f32[1,512], index: 4, kind: input, shape index: {}]   ;;  %s2863_s5 = inlined_call_operand.hbm [shape: bf16[128,128], index: 5, kind: input, shape index: {}]   ;;  %s2864_s6 = inlined_call_operand.hbm [shape: f32[1,128], index: 6, kind: input, shape index: {}]   ;;  %s2865_s7 = inlined_call_operand.hbm [shape: bf16[512,128], index: 7, kind: input, shape index: {}]   ;;  %s2866_s8 = inlined_call_operand.vmem [shape: bf16[128,128], index: 8, kind: input, shape index: {}]   ;;  %s2867_s9 = inlined_call_operand.hbm [shape: f32[1,128], index: 9, kind: input, shape index: {}]   ;;  %s2868_s10 = inlined_call_operand.vmem [shape: f32[32,128], index: 10, kind: output, shape index: {}]  }
   0x1   :  { %2873 = sst [smem:[#allocation17_spill]] %s2861_s3 }
   0x2   :  { %15 = vsyncpa [#allocation3], 0 }
   0x3   :  { %16 = vsyncpa [#allocation5], 0 }
   0x4   :  { %17 = vsyncpa [#allocation8], 0 }
   0x5   :  { %18 = vsyncpa [#allocation11], 0  ;;  %s2582_s13 = smov 0  }
   0x6 LB: > { %s2511_s14 = smov [#allocation4]   ;;  %s2869_s16 = sadd.s32 4294967295, %s2509_s13   ;;  %s2509_s13 = sphi %s2582_s13, %s24_s13  }
   0x7   : > { %s298_s15 = sshll.u32 %s2511_s14, 4  ;;  %p1801_p0 = scmp.ge.s32.totalorder %s2509_s13, 1  ;;  %s2596_s15 = int_to_ptr.vmem [resolvable:$true] %s298_s15 }
   0x8   : > { %p270_p1 = scmp.lt.s32.totalorder %s2509_s13, 3  ;;  %p2592_p2 = scmp.eq.s32.totalorder %s2869_s16, 0 }
   0x9   : > { %s2512_s19 = smov [#allocation7]   ;;  %s2513_s22 = smov [#allocation10]  }
   0xa   : > { %s2874_s17 = scalar_select %p2592_p2, 1, 0 }
   0xb   : > { %p2598_p3 = pnand %p1801_p0, %p270_p1  ;;  %s322_s20 = sshll.u32 %s2512_s19, 4  ;;  %s2604_s20 = int_to_ptr.vmem [resolvable:$true] %s322_s20 }
   0xc   : > { %s2612_s23 = sshll.u32 %s2513_s22, 4  ;;  %s2877_s3 = sld [smem:[#allocation17_spill]]  ;;  %s347_s23 = int_to_ptr.vmem [resolvable:$true] %s2612_s23 }
   0xd   : > { %s2875_s18 = scalar_select %p2598_p3, 1, 0 }
   0xe   : > { %p2082_p4 = pneg %p2598_p3 }
  0x10   : > { %p2608_p5 = pnand %p2592_p2, %p2082_p4 }
  0x12   : > { %s2291_s26 = scalar_lea.hbm %s2877_s3, 8192  ;;  %p2622_p7 = pneg %p2608_p5 }
  0x13   : > { %p2292_p6 = scmp.ne.s32.totalorder %s2877_s3, %s2291_s26  ;;  %p2298_p10 = scmp.lt.u32.totalorder %s2291_s26, %s2877_s3 }
  0x15   : > { %p2294_p8 = pnand %p2622_p7, %p2292_p6 }
  0x17   : > { %p2295_p9 = pneg %p2294_p8 }
  0x19   : > { %p2300_p11 = pnand %p2298_p10, %p2295_p9 }
  0x1b   : > { %2303 = shalt.err (!%p2300_p11)
}
  0x1c   : > { %s2304_s12 = scalar_lea.vmem %s2596_s15, 8192  ;;  %p2312_p1 = scmp.lt.s32.totalorder %s2596_s15, %s2596_s15 }
  0x1d   : > { %p2305_p12 = scmp.ne.s32.totalorder %s2596_s15, %s2304_s12  ;;  %p2313_p4 = scmp.lt.s32.totalorder %s2304_s12, %s2304_s12 }
  0x1f   : > { %p2307_p13 = pnand %p2305_p12, %p2622_p7  ;;  %p2314_p6 = por %p2313_p4, %p2312_p1 }
  0x21   : > { %p2308_p0 = pneg %p2307_p13 }
  0x23   : > { %p2315_p8 = pnand %p2314_p6, %p2308_p0 }
  0x25   : > { %2318 = shalt.err (!%p2315_p8)
}
  0x26   : > { %s2514_s14 = smov 256   ;;  %s2515_s19 = smov 16  }
  0x27   : > { %2088 = dma.hbm_to_vmem [thread:$0]  (!%p2608_p5), %s2877_s3, 8192, %s2596_s15, [#allocation5], %s2514_s14, %s2514_s14, %s2515_s19  }
  0x28   : > { %s2319_s27 = scalar_lea.hbm %s2863_s5, 1024 }
  0x29   : > { %p2320_p9 = scmp.ne.s32.totalorder %s2863_s5, %s2319_s27  ;;  %p2326_p12 = scmp.lt.u32.totalorder %s2319_s27, %s2863_s5 }
  0x2b   : > { %p2322_p10 = pnand %p2320_p9, %p2622_p7 }
  0x2d   : > { %p2323_p11 = pneg %p2322_p10 }
  0x2f   : > { %p2328_p13 = pnand %p2326_p12, %p2323_p11 }
  0x31   : > { %2331 = shalt.err (!%p2328_p13)
}
  0x32   : > { %s2332_s15 = scalar_lea.vmem %s2604_s20, 1024  ;;  %p2340_p6 = scmp.lt.s32.totalorder %s2604_s20, %s2604_s20 }
  0x33   : > { %p2333_p0 = scmp.ne.s32.totalorder %s2604_s20, %s2332_s15  ;;  %p2341_p8 = scmp.lt.s32.totalorder %s2332_s15, %s2332_s15 }
  0x35   : > { %p2335_p1 = pnand %p2333_p0, %p2622_p7  ;;  %p2342_p9 = por %p2341_p8, %p2340_p6 }
  0x37   : > { %p2336_p4 = pneg %p2335_p1 }
  0x39   : > { %p2343_p10 = pnand %p2342_p9, %p2336_p4 }
  0x3b   : > { %2346 = shalt.err (!%p2343_p10)
}
  0x3c   : > { %s2516_s14 = smov 64   ;;  %s2517_s19 = smov 4  }
  0x3d   : > { %2094 = dma.hbm_to_vmem [thread:$0]  (!%p2608_p5), %s2863_s5, 1024, %s2604_s20, [#allocation8], %s2516_s14, %s2516_s14, %s2517_s19  }
  0x3e   : > { %s2518_s25 = smov [#allocation2]   ;;  %s2347_s30 = scalar_lea.hbm %s2865_s7, 4096 }
  0x3f   : > { %s282_s26 = sshll.u32 %s2518_s25, 4  ;;  %p2348_p11 = scmp.ne.s32.totalorder %s2865_s7, %s2347_s30  ;;  %s283_s26 = int_to_ptr.vmem [resolvable:$true] %s282_s26 }
  0x40   : > { %p2354_p0 = scmp.lt.u32.totalorder %s2347_s30, %s2865_s7 }
  0x41   : > { %p2350_p12 = pnand %p2348_p11, %p2622_p7 }
  0x43   : > { %p2351_p13 = pneg %p2350_p12 }
  0x45   : > { %p2356_p1 = pnand %p2354_p0, %p2351_p13 }
  0x47   : > { %2359 = shalt.err (!%p2356_p1)
}
  0x48   : > { %s2360_s20 = scalar_lea.vmem %s347_s23, 4096  ;;  %p2368_p9 = scmp.lt.s32.totalorder %s347_s23, %s347_s23 }
  0x49   : > { %p2361_p4 = scmp.ne.s32.totalorder %s347_s23, %s2360_s20  ;;  %p2369_p10 = scmp.lt.s32.totalorder %s2360_s20, %s2360_s20 }
  0x4b   : > { %p2363_p6 = pnand %p2361_p4, %p2622_p7  ;;  %p2370_p2 = por %p2369_p10, %p2368_p9 }
  0x4d   : > { %p2364_p8 = pneg %p2363_p6 }
  0x4f   : > { %p2371_p3 = pnand %p2370_p2, %p2364_p8 }
  0x51   : > { %2374 = shalt.err (!%p2371_p3)
}
  0x52   : > { %2100 = dma.hbm_to_vmem [thread:$0]  (!%p2608_p5), %s2865_s7, 4096, %s347_s23, [#allocation11], %s2516_s14, %s2516_s14, %s2517_s19  }
  0x53   : > { %s2375_s27 = scalar_lea.hbm %s2859_s1, 384 }
  0x54   : > { %p2376_p11 = scmp.ne.s32.totalorder %s2859_s1, %s2375_s27  ;;  %p2382_p3 = scmp.lt.u32.totalorder %s2375_s27, %s2859_s1 }
  0x56   : > { %p2378_p12 = pnand %p2376_p11, %p2622_p7 }
  0x58   : > { %p2379_p2 = pneg %p2378_p12 }
  0x5a   : > { %p2384_p13 = pnand %p2382_p3, %p2379_p2 }
  0x5c   : > { %2387 = shalt.err (!%p2384_p13)
}
  0x5d   : > { %s2388_s15 = scalar_lea.vmem %s283_s26, 384  ;;  %p2396_p6 = scmp.lt.s32.totalorder %s283_s26, %s283_s26 }
  0x5e   : > { %p2389_p0 = scmp.ne.s32.totalorder %s283_s26, %s2388_s15  ;;  %p2397_p8 = scmp.lt.s32.totalorder %s2388_s15, %s2388_s15 }
  0x60   : > { %p2391_p1 = pnand %p2389_p0, %p2622_p7  ;;  %p2398_p9 = por %p2397_p8, %p2396_p6 }
  0x62   : > { %p2392_p4 = pneg %p2391_p1 }
  0x64   : > { %p2399_p10 = pnand %p2398_p9, %p2392_p4 }
  0x66   : > { %2402 = shalt.err (!%p2399_p10)
}
  0x67   : > { %s2519_s23 = smov 192   ;;  %s2520_s14 = smov 12  }
  0x68   : > { %2085 = dma.hbm_to_vmem [thread:$0]  (!%p2608_p5), %s2859_s1, 384, %s283_s26, [#allocation3], %s2519_s23, %s2519_s23, %s2520_s14  }
  0x69   : > { %s2521_s22 = smov [#allocation6]   ;;  %s2522_s16 = smov [#allocation9]  }
  0x6a   : > { %s312_s24 = sshll.u32 %s2521_s22, 4  ;;  %s336_s25 = sshll.u32 %s2522_s16, 4  ;;  %s313_s24 = int_to_ptr.vmem [resolvable:$true] %s312_s24  ;;  %s337_s25 = int_to_ptr.vmem [resolvable:$true] %s336_s25 }
  0x6b   : > { %s2403_s30 = scalar_lea.hbm %s2862_s4, 64 }
  0x6c   : > { %p2404_p11 = scmp.ne.s32.totalorder %s2862_s4, %s2403_s30  ;;  %p2410_p3 = scmp.lt.u32.totalorder %s2403_s30, %s2862_s4 }
  0x6e   : > { %p2406_p12 = pnand %p2404_p11, %p2622_p7 }
  0x70   : > { %p2407_p2 = pneg %p2406_p12 }
  0x72   : > { %p2412_p13 = pnand %p2410_p3, %p2407_p2 }
  0x74   : > { %2415 = shalt.err (!%p2412_p13)
}
  0x75   : > { %s2416_s26 = scalar_lea.vmem %s313_s24, 64  ;;  %p2424_p6 = scmp.lt.s32.totalorder %s313_s24, %s313_s24 }
  0x76   : > { %p2417_p0 = scmp.ne.s32.totalorder %s313_s24, %s2416_s26  ;;  %p2425_p8 = scmp.lt.s32.totalorder %s2416_s26, %s2416_s26 }
  0x78   : > { %p2419_p1 = pnand %p2417_p0, %p2622_p7  ;;  %p2426_p9 = por %p2425_p8, %p2424_p6 }
  0x7a   : > { %p2420_p4 = pneg %p2419_p1 }
  0x7c   : > { %p2427_p10 = pnand %p2426_p9, %p2420_p4 }
  0x7e   : > { %2430 = shalt.err (!%p2427_p10)
}
  0x7f   : > { %2091 = dma.hbm_to_vmem [thread:$0]  (!%p2608_p5), %s2862_s4, 64, %s313_s24, [#allocation5]  }
  0x80   : > { %s2431_s20 = scalar_lea.hbm %s2864_s6, 16 }
  0x81   : > { %p2432_p11 = scmp.ne.s32.totalorder %s2864_s6, %s2431_s20  ;;  %p2438_p3 = scmp.lt.u32.totalorder %s2431_s20, %s2864_s6 }
  0x83   : > { %p2434_p12 = pnand %p2432_p11, %p2622_p7 }
  0x85   : > { %p2435_p2 = pneg %p2434_p12 }
  0x87   : > { %p2440_p13 = pnand %p2438_p3, %p2435_p2 }
  0x89   : > { %2443 = shalt.err (!%p2440_p13)
}
  0x8a   : > { %s2444_s30 = scalar_lea.vmem %s337_s25, 16  ;;  %s2451_s24 = scalar_lea.vmem %s337_s25, 32 }
  0x8b   : > { %p2445_p0 = scmp.ne.s32.totalorder %s337_s25, %s2444_s30  ;;  %p2452_p6 = scmp.lt.s32.totalorder %s337_s25, %s337_s25 }
  0x8c   : > { %p2453_p8 = scmp.lt.s32.totalorder %s2451_s24, %s2444_s30 }
  0x8d   : > { %p2447_p1 = pnand %p2445_p0, %p2622_p7 }
  0x8e   : > { %p2454_p9 = por %p2453_p8, %p2452_p6 }
  0x8f   : > { %p2448_p4 = pneg %p2447_p1 }
  0x91   : > { %p2455_p10 = pnand %p2454_p9, %p2448_p4 }
  0x93   : > { %2458 = shalt.err (!%p2455_p10)
}
  0x94   : > { %2097 = dma.hbm_to_vmem [thread:$0]  (!%p2608_p5), %s2864_s6, 16, %s337_s25, [#allocation8]  }
  0x95   : > { %s2523_s15 = smov [#allocation12]   ;;  %s2459_s3 = scalar_lea.hbm %s2867_s9, 16 }
  0x96   : > { %s363_s26 = sshll.u32 %s2523_s15, 4  ;;  %p2460_p11 = scmp.ne.s32.totalorder %s2867_s9, %s2459_s3  ;;  %s364_s26 = int_to_ptr.vmem [resolvable:$true] %s363_s26 }
  0x97   : > { %p2466_p3 = scmp.lt.u32.totalorder %s2459_s3, %s2867_s9 }
  0x98   : > { %p2462_p12 = pnand %p2460_p11, %p2622_p7 }
  0x9a   : > { %p2463_p2 = pneg %p2462_p12 }
  0x9c   : > { %p2468_p13 = pnand %p2466_p3, %p2463_p2 }
  0x9e   : > { %2471 = shalt.err (!%p2468_p13)
}
  0x9f   : > { %s2472_s25 = scalar_lea.vmem %s364_s26, 16  ;;  %s2479_s27 = scalar_lea.vmem %s364_s26, 32 }
  0xa0   : > { %p2473_p0 = scmp.ne.s32.totalorder %s364_s26, %s2472_s25  ;;  %p2480_p6 = scmp.lt.s32.totalorder %s364_s26, %s364_s26 }
  0xa1   : > { %p2481_p8 = scmp.lt.s32.totalorder %s2479_s27, %s2472_s25 }
  0xa2   : > { %p2475_p1 = pnand %p2473_p0, %p2622_p7 }
  0xa3   : > { %p2482_p9 = por %p2481_p8, %p2480_p6 }
  0xa4   : > { %p2476_p4 = pneg %p2475_p1 }
  0xa6   : > { %p2483_p10 = pnand %p2482_p9, %p2476_p4 }
  0xa8   : > { %2486 = shalt.err (!%p2483_p10)
}
  0xa9   : > { %2103 = dma.hbm_to_vmem [thread:$0]  (!%p2608_p5), %s2867_s9, 16, %s364_s26, [#allocation11]  }
  0xaa   : > { %p2879_p11 = scmp.ne.s32.totalorder %s2875_s18, 0 }
  0xab   : > { %p2880_p12 = scmp.ne.s32.totalorder (!%p2879_p11), %s2874_s17, 0 }
  0xac   : > { %385 = sbr.rel (%p2879_p11) target bundleno = 922 (0x39a), region = 60 }
  0xb3   : > { %2492 = dma.done.wait (%p2880_p12), [#allocation3], 384  }
  0xb4   : > { %2494 = vsyncadd (%p2880_p12), [#allocation3], 4294966912 }
  0xb5   : > { %2496 = dma.done.wait (%p2880_p12), [#allocation5], 8256  }
  0xb6   : > { %2498 = vsyncadd (%p2880_p12), [#allocation5], 4294959040 }
  0xb7   : > { %2500 = dma.done.wait (%p2880_p12), [#allocation8], 1040  }
  0xb8   : > { %2502 = vsyncadd (%p2880_p12), [#allocation8], 4294966256 }
  0xb9   : > { %2504 = dma.done.wait (%p2880_p12), [#allocation11], 4112  }
  0xba   : > { %2506 = vsyncadd (%p2880_p12), [#allocation11], 4294963184  ;;  %s2881_s18 = sadd.s32 4294967295, %s2509_s13   ;;  %v2524_v0 = vmov 0   ;;  %v2525_v1 = vmov 0.0   ;;  %vm2526_vm0 = vmmov 0  }
  0xbb   : > { %s1818_s21 = sshll.u32 %s2881_s18, 1  ;;  %540 = vmatprep.mubr.bf16.mxu0 %v2524_v0  ;;  %2008 = vmatprep.subr.bf16.mxu1 %v2525_v1  ;;  %v2142_v2 = vld [vmem:[#allocation2 + $0x4] ss:$12 sps:$4 sm:$0xff]   ;;  %v2144_v3 = vld [vmem:[#allocation2] ss:$12 sps:$4 sm:$0xff]   ;;  %vm504_vm1 = vcmask 130048  }
  0xbc   : > { %p448_p5 = scmp.lt.s32.totalorder %s1818_s21, 3  ;;  %2010 = vmatprep.mubr.msk.bf16.mxu1 %vm2526_vm0, %v2525_v1  ;;  %508 = vmatprep.subr.bf16.mxu0 %v2142_v2  ;;  %v2146_v5 = vld [vmem:[#allocation2 + $0x8] ss:$12 sps:$4 sm:$0xff]   ;;  %v2149_v7 = vld [vmem:[#allocation4 + $0x4] ss:$16 sps:$4 sm:$0xff]  }
  0xbd   : > { %509 = vmatpush1.bf16.msra.mxu0 %v2144_v3  ;;  %v2147_v6 = vld [vmem:[#allocation4] ss:$16 sps:$4 sm:$0xff]   ;;  %2009 = vmatpush3.bf16.msra.mxu1 %v2146_v5  ;;  %v2150_v8 = vld [vmem:[#allocation4 + $0x8] ss:$16 sps:$4 sm:$0xff]   ;;  %v2152_v9 = vld [vmem:[#allocation4 + $0xc] ss:$16 sps:$4 sm:$0xff]  }
  0xbe   : > { %s2883_s21 = smov (!%p448_p5, %s1818_s21), 3  ;;  %1007 = vmatprep.subr.bf16.mxu0 %v2149_v7  ;;  %v2153_v10 = vld [vmem:[#allocation4 + $0x20] ss:$16 sps:$4 sm:$0xff]   ;;  %1050 = vmatprep.subr.bf16.mxu1 %v2152_v9  ;;  %v2155_v11 = vld [vmem:[#allocation4 + $0x24] ss:$16 sps:$4 sm:$0xff]   ;;  %v468_v7 = vlaneseq }
  0xbf   : > { %s1819_s29 = sshll.u32 %s2883_s21, 2  ;;  %v2158_v12 = vld [vmem:[#allocation4 + $0x2c] ss:$16 sps:$4 sm:$0xff]   ;;  %v2156_v13 = vld [vmem:[#allocation4 + $0x28] ss:$16 sps:$4 sm:$0xff]  }
  0xc0   : > { %s451_s11 = scalar_lea.vmem %s2858_s0, %s1819_s29  ;;  %v2161_v14 = vld [vmem:[#allocation4 + $0x44] ss:$16 sps:$4 sm:$0xff]   ;;  %v2159_v15 = vld [vmem:[#allocation4 + $0x40] ss:$16 sps:$4 sm:$0xff]   ;;  %v2164_v16 = vld [vmem:[#allocation4 + $0x4c] ss:$16 sps:$4 sm:$0xff]  }
  0xc1   : > { %v2145_v4 = vld [vmem:[%s451_s11] sm:$0xff]   ;;  %v2167_v17 = vld [vmem:[#allocation4 + $0x64] ss:$16 sps:$4 sm:$0xff]   ;;  %v2165_v20 = vld [vmem:[#allocation4 + $0x60] ss:$16 sps:$4 sm:$0xff]   ;;  %s1821_s11 = sshll.u32 %s2883_s21, 3 }
  0xc2   : > { %1826 = vmatmul.mubr.msk.bf16.vlgmr.msra.gmra.mrb[0].mxu0 %vm504_vm1, %v2145_v4  ;;  %2011 = vmatmul.mubr.msk.bf16.vlgmr.msra.gmra.mrb[0].mxu1 %vm504_vm1, %v2145_v4  ;;  %v2162_v18 = vld [vmem:[#allocation4 + $0x48] ss:$16 sps:$4 sm:$0xff]   ;;  %v2170_v19 = vld [vmem:[#allocation4 + $0x6c] ss:$16 sps:$4 sm:$0xff]   ;;  %v2173_v21 = vld [vmem:[#allocation4 + $0x84] ss:$16 sps:$4 sm:$0xff]   ;;  %s457_s26 = scalar_lea.vmem %s2868_s10, %s1821_s11 }
  0xc3   : > { %1008 = vmatpush1.bf16.msra.mxu0 %v2147_v6  ;;  %1051 = vmatpush1.bf16.msra.mxu1 %v2150_v8  ;;  %v2168_v22 = vld [vmem:[#allocation4 + $0x68] ss:$16 sps:$4 sm:$0xff]   ;;  %v2176_v23 = vld [vmem:[#allocation4 + $0x8c] ss:$16 sps:$4 sm:$0xff]   ;;  %v2171_v24 = vld [vmem:[#allocation4 + $0x80] ss:$16 sps:$4 sm:$0xff]  }
  0xc4   : > { %1009 = vmatprep.subr.bf16.mxu0 %v2155_v11  ;;  %1052 = vmatprep.subr.bf16.mxu1 %v2158_v12  ;;  %v2179_v25 = vld [vmem:[#allocation4 + $0xa4] ss:$16 sps:$4 sm:$0xff]   ;;  %v2174_v26 = vld [vmem:[#allocation4 + $0x88] ss:$16 sps:$4 sm:$0xff]   ;;  %v2182_v27 = vld [vmem:[#allocation4 + $0xac] ss:$16 sps:$4 sm:$0xff]  }
  0xc5   : > { %v2177_v28 = vld [vmem:[#allocation4 + $0xa0] ss:$16 sps:$4 sm:$0xff]   ;;  %v2185_v29 = vld [vmem:[#allocation4 + $0xc4] ss:$16 sps:$4 sm:$0xff]   ;;  %v2180_v30 = vld [vmem:[#allocation4 + $0xa8] ss:$16 sps:$4 sm:$0xff]  }
  0xc6   : > { %v2188_v31 = vld [vmem:[#allocation4 + $0xcc] ss:$16 sps:$4 sm:$0xff]   ;;  %v2183_v32 = vld [vmem:[#allocation4 + $0xc0] ss:$16 sps:$4 sm:$0xff]   ;;  %v2191_v33 = vld [vmem:[#allocation4 + $0xe4] ss:$16 sps:$4 sm:$0xff]  }
  0xc7   : > { %1010 = vmatpush1.bf16.msra.mxu0 %v2153_v10  ;;  %1053 = vmatpush1.bf16.msra.mxu1 %v2156_v13  ;;  %v2186_v34 = vld [vmem:[#allocation4 + $0xc8] ss:$16 sps:$4 sm:$0xff]   ;;  %v2194_v35 = vld [vmem:[#allocation4 + $0xec] ss:$16 sps:$4 sm:$0xff]   ;;  %v2189_v36 = vld [vmem:[#allocation4 + $0xe0] ss:$16 sps:$4 sm:$0xff]  }
  0xc8   : > { %1011 = vmatprep.subr.bf16.mxu0 %v2161_v14  ;;  %1054 = vmatprep.subr.bf16.mxu1 %v2164_v16  ;;  %v2197_v37 = vld [vmem:[#allocation4 + $0x104] ss:$16 sps:$4 sm:$0xff]   ;;  %v2192_v38 = vld [vmem:[#allocation4 + $0xe8] ss:$16 sps:$4 sm:$0xff]   ;;  %v2200_v39 = vld [vmem:[#allocation4 + $0x10c] ss:$16 sps:$4 sm:$0xff]  }
  0xc9   : > { %v2195_v40 = vld [vmem:[#allocation4 + $0x100] ss:$16 sps:$4 sm:$0xff]   ;;  %v2203_v41 = vld [vmem:[#allocation4 + $0x124] ss:$16 sps:$4 sm:$0xff]   ;;  %v2198_v42 = vld [vmem:[#allocation4 + $0x108] ss:$16 sps:$4 sm:$0xff]  }
  0xca   : > { %v2206_v43 = vld [vmem:[#allocation4 + $0x12c] ss:$16 sps:$4 sm:$0xff]   ;;  %v2201_v44 = vld [vmem:[#allocation4 + $0x120] ss:$16 sps:$4 sm:$0xff]   ;;  %v2204_v45 = vld [vmem:[#allocation4 + $0x128] ss:$16 sps:$4 sm:$0xff]  }
  0xcb   : > { %1012 = vmatpush1.bf16.msra.mxu0 %v2159_v15  ;;  %1055 = vmatpush1.bf16.msra.mxu1 %v2162_v18  ;;  %v2209_v46 = vld [vmem:[#allocation4 + $0x144] ss:$16 sps:$4 sm:$0xff]   ;;  %v2212_v47 = vld [vmem:[#allocation4 + $0x14c] ss:$16 sps:$4 sm:$0xff]   ;;  %v2207_v48 = vld [vmem:[#allocation4 + $0x140] ss:$16 sps:$4 sm:$0xff]  }
  0xcc   : > { %1013 = vmatprep.subr.bf16.mxu0 %v2167_v17  ;;  %1056 = vmatprep.subr.bf16.mxu1 %v2170_v19  ;;  %v2215_v49 = vld [vmem:[#allocation4 + $0x164] ss:$16 sps:$4 sm:$0xff]   ;;  %v2210_v50 = vld [vmem:[#allocation4 + $0x148] ss:$16 sps:$4 sm:$0xff]   ;;  %v2218_v51 = vld [vmem:[#allocation4 + $0x16c] ss:$16 sps:$4 sm:$0xff]  }
  0xcd   : > { %v2213_v52 = vld [vmem:[#allocation4 + $0x160] ss:$16 sps:$4 sm:$0xff]   ;;  %v2221_v53 = vld [vmem:[#allocation4 + $0x184] ss:$16 sps:$4 sm:$0xff]   ;;  %v2216_v54 = vld [vmem:[#allocation4 + $0x168] ss:$16 sps:$4 sm:$0xff]  }
  0xce   : > { %v2224_v55 = vld [vmem:[#allocation4 + $0x18c] ss:$16 sps:$4 sm:$0xff]   ;;  %v2219_v56 = vld [vmem:[#allocation4 + $0x180] ss:$16 sps:$4 sm:$0xff]   ;;  %v2227_v57 = vld [vmem:[#allocation4 + $0x1a4] ss:$16 sps:$4 sm:$0xff]  }
  0xcf   : > { %1014 = vmatpush1.bf16.msra.mxu0 %v2165_v20  ;;  %1057 = vmatpush1.bf16.msra.mxu1 %v2168_v22  ;;  %v2222_v58 = vld [vmem:[#allocation4 + $0x188] ss:$16 sps:$4 sm:$0xff]   ;;  %v2230_v59 = vld [vmem:[#allocation4 + $0x1ac] ss:$16 sps:$4 sm:$0xff]   ;;  %v2225_v60 = vld [vmem:[#allocation4 + $0x1a0] ss:$16 sps:$4 sm:$0xff]  }
  0xd0   : > { %1015 = vmatprep.subr.bf16.mxu0 %v2173_v21  ;;  %1058 = vmatprep.subr.bf16.mxu1 %v2176_v23  ;;  %v2228_v61 = vld [vmem:[#allocation4 + $0x1a8] ss:$16 sps:$4 sm:$0xff]   ;;  %v2233_v62 = vld [vmem:[#allocation4 + $0x1c4] ss:$16 sps:$4 sm:$0xff]   ;;  %v2231_v63 = vld [vmem:[#allocation4 + $0x1c0] ss:$16 sps:$4 sm:$0xff]  }
  0xd1   : > { %v2236_v0 = vld [vmem:[#allocation4 + $0x1cc] ss:$16 sps:$4 sm:$0xff]   ;;  %v2234_v2 = vld [vmem:[#allocation4 + $0x1c8] ss:$16 sps:$4 sm:$0xff]   ;;  %v2239_v3 = vld [vmem:[#allocation4 + $0x1e4] ss:$16 sps:$4 sm:$0xff]  }
  0xd2   : > { %v2237_v4 = vld [vmem:[#allocation4 + $0x1e0] ss:$16 sps:$4 sm:$0xff]   ;;  %v2242_v5 = vld [vmem:[#allocation4 + $0x1ec] ss:$16 sps:$4 sm:$0xff]   ;;  %v2240_v6 = vld [vmem:[#allocation4 + $0x1e8] ss:$16 sps:$4 sm:$0xff]  }
  0xd3   : > { %1016 = vmatpush1.bf16.msra.mxu0 %v2171_v24  ;;  %1059 = vmatpush1.bf16.msra.mxu1 %v2174_v26  ;;  %v2788_v8 = vshrl.u32 %v468_v7, 7  ;;  %v466_v10 = vld [vmem:[%s2860_s2] sm:$0x7]  ;;  %v2274_v7 = vld [vmem:[%s2866_s8 + $0x38] sm:$0xff]  }
  0xd4   : > { %1017 = vmatprep.subr.bf16.mxu0 %v2179_v25  ;;  %1060 = vmatprep.subr.bf16.mxu1 %v2182_v27 }
  0xd5   : > { %v470_v9 = vsub.s32 0, %v2788_v8  ;;  %v474_v11 = vsub.s32 1, %v2788_v8  ;;  %v478_v12 = vsub.s32 2, %v2788_v8 }
  0xd7   : > { %1018 = vmatpush1.bf16.msra.mxu0 %v2177_v28  ;;  %1061 = vmatpush1.bf16.msra.mxu1 %v2180_v30  ;;  %v471_v13 = vrot.slane %v466_v10, %v470_v9  ;;  %v475_v14 = vrot.slane %v466_v10, %v474_v11  ;;  %v479_v15 = vrot.slane %v466_v10, %v478_v12  ;;  %v2275_v10 = vld [vmem:[#allocation10 + $0xc0] sm:$0xff]  }
  0xd8   : > { %1019 = vmatprep.subr.bf16.mxu0 %v2185_v29  ;;  %1062 = vmatprep.subr.bf16.mxu1 %v2188_v31 }
  0xdb   : > { %1020 = vmatpush1.bf16.msra.mxu0 %v2183_v32  ;;  %1063 = vmatpush1.bf16.msra.mxu1 %v2186_v34 }
  0xdc   : > { %1021 = vmatprep.subr.bf16.mxu0 %v2191_v33  ;;  %1064 = vmatprep.subr.bf16.mxu1 %v2194_v35 }
  0xdf   : > { %1022 = vmatpush1.bf16.msra.mxu0 %v2189_v36  ;;  %1065 = vmatpush1.bf16.msra.mxu1 %v2192_v38  ;;  %v2243_v38 = vld [vmem:[#allocation7] sm:$0xff]  }
  0xe0   : > { %1023 = vmatprep.subr.bf16.mxu0 %v2197_v37  ;;  %1066 = vmatprep.subr.bf16.mxu1 %v2200_v39 }
  0xe3   : > { %1024 = vmatpush1.bf16.msra.mxu0 %v2195_v40  ;;  %1067 = vmatpush1.bf16.msra.mxu1 %v2198_v42  ;;  %v2244_v40 = vld [vmem:[#allocation7 + $0x8] sm:$0xff]   ;;  %v2246_v42 = vld [vmem:[#allocation7 + $0x18] sm:$0xff]  }
  0xe4   : > { %1025 = vmatprep.subr.bf16.mxu0 %v2203_v41  ;;  %1068 = vmatprep.subr.bf16.mxu1 %v2206_v43  ;;  %v2245_v41 = vld [vmem:[#allocation7 + $0x10] sm:$0xff]   ;;  %v2247_v43 = vld [vmem:[#allocation7 + $0x20] sm:$0xff]  }
  0xe7   : > { %1026 = vmatpush1.bf16.msra.mxu0 %v2201_v44  ;;  %1069 = vmatpush1.bf16.msra.mxu1 %v2204_v45  ;;  %v2248_v44 = vld [vmem:[#allocation7 + $0x28] sm:$0xff]   ;;  %v2249_v45 = vld [vmem:[#allocation7 + $0x30] sm:$0xff]  }
  0xe8   : > { %1027 = vmatprep.subr.bf16.mxu0 %v2209_v46  ;;  %1070 = vmatprep.subr.bf16.mxu1 %v2212_v47  ;;  %v2250_v46 = vld [vmem:[#allocation7 + $0x38] sm:$0xff]   ;;  %v2251_v47 = vld [vmem:[#allocation10 + $0x40] sm:$0xff]  }
  0xeb   : > { %1028 = vmatpush1.bf16.msra.mxu0 %v2207_v48  ;;  %1071 = vmatpush1.bf16.msra.mxu1 %v2210_v50  ;;  %v2252_v48 = vld [vmem:[#allocation10] sm:$0xff]   ;;  %v2254_v50 = vld [vmem:[#allocation10 + $0x8] sm:$0xff]  }
  0xec   : > { %1029 = vmatprep.subr.bf16.mxu0 %v2215_v49  ;;  %1072 = vmatprep.subr.bf16.mxu1 %v2218_v51  ;;  %v2253_v49 = vld [vmem:[#allocation10 + $0x48] sm:$0xff]   ;;  %v2255_v51 = vld [vmem:[#allocation10 + $0x50] sm:$0xff]  }
  0xef   : > { %1030 = vmatpush1.bf16.msra.mxu0 %v2213_v52  ;;  %1073 = vmatpush1.bf16.msra.mxu1 %v2216_v54  ;;  %v2256_v52 = vld [vmem:[#allocation10 + $0x10] sm:$0xff]   ;;  %v2258_v54 = vld [vmem:[#allocation10 + $0x18] sm:$0xff]  }
  0xf0   : > { %1031 = vmatprep.subr.bf16.mxu0 %v2221_v53  ;;  %1074 = vmatprep.subr.bf16.mxu1 %v2224_v55  ;;  %v2257_v53 = vld [vmem:[#allocation10 + $0x58] sm:$0xff]   ;;  %v2259_v55 = vld [vmem:[#allocation10 + $0x60] sm:$0xff]  }
  0xf3   : > { %1032 = vmatpush1.bf16.msra.mxu0 %v2219_v56  ;;  %1075 = vmatpush1.bf16.msra.mxu1 %v2222_v58  ;;  %v2260_v56 = vld [vmem:[#allocation10 + $0x20] sm:$0xff]   ;;  %v2262_v58 = vld [vmem:[#allocation10 + $0x28] sm:$0xff]  }
  0xf4   : > { %1033 = vmatprep.subr.bf16.mxu0 %v2227_v57  ;;  %1076 = vmatprep.subr.bf16.mxu1 %v2230_v59  ;;  %v2261_v57 = vld [vmem:[#allocation10 + $0x68] sm:$0xff]   ;;  %v2263_v59 = vld [vmem:[#allocation10 + $0x70] sm:$0xff]  }
  0xf7   : > { %1034 = vmatpush1.bf16.msra.mxu0 %v2225_v60  ;;  %1077 = vmatpush1.bf16.msra.mxu1 %v2228_v61  ;;  %v2264_v60 = vld [vmem:[#allocation10 + $0x30] sm:$0xff]   ;;  %v2265_v61 = vld [vmem:[#allocation10 + $0x78] sm:$0xff]  }
  0xf8   : > { %1035 = vmatprep.subr.bf16.mxu0 %v2233_v62  ;;  %1078 = vmatprep.subr.bf16.mxu1 %v2236_v0  ;;  %v2266_v62 = vld [vmem:[%s2866_s8] sm:$0xff]   ;;  %v2268_v0 = vld [vmem:[%s2866_s8 + $0x8] sm:$0xff]  }
  0xfb   : > { %1036 = vmatpush1.bf16.msra.mxu0 %v2231_v63  ;;  %1079 = vmatpush1.bf16.msra.mxu1 %v2234_v2  ;;  %v2267_v63 = vld [vmem:[#allocation10 + $0x38] sm:$0xff]  }
  0xfc   : > { %1037 = vmatprep.subr.bf16.mxu0 %v2239_v3  ;;  %1080 = vmatprep.subr.bf16.mxu1 %v2242_v5  ;;  %v2269_v2 = vld [vmem:[%s2866_s8 + $0x10] sm:$0xff]   ;;  %v2270_v3 = vld [vmem:[%s2866_s8 + $0x18] sm:$0xff]   ;;  %v2272_v5 = vld [vmem:[%s2866_s8 + $0x28] sm:$0xff]  }
  0xff   : > { %1038 = vmatpush1.bf16.msra.mxu0 %v2237_v4  ;;  %1081 = vmatpush1.bf16.msra.mxu1 %v2240_v6  ;;  %v2271_v4 = vld [vmem:[%s2866_s8 + $0x20] sm:$0xff]   ;;  %v2273_v6 = vld [vmem:[%s2866_s8 + $0x30] sm:$0xff]  }
 0x100   : > { %2014 = vmatprep.subr.bf16.mxu0 %v2525_v1  ;;  %2034 = vmatprep.subr.bf16.mxu1 %v2525_v1 }
 0x195   : > { %v542_v16 = vpop.f32.mrb[0].mxu0  ;;  %v585_v21 = vpop.f32.mrb[0].mxu1 }
 0x196   : > { %v543_v17 = vadd.f32 %v542_v16, %v471_v13  ;;  %v544_v18 = vpop.f32.mrb[1].mxu0  ;;  %v586_v24 = vadd.f32 %v585_v21, %v479_v15  ;;  %v2012_v25 = vpop.f32.mrb[1].mxu1 }
 0x197   : > { %v545_v19 = vadd.f32 %v544_v18, %v475_v14  ;;  %v546_v20 = vpop.f32.mrb[2].mxu0  ;;  %v588_v27 = vpop.f32.mrb[2].mxu1 }
 0x198   : > { %v547_v22 = vadd.f32 %v546_v20, %v471_v13  ;;  %v548_v23 = vpop.f32.mrb[3].mxu0  ;;  %v592_v28 = vmax.f32 %v543_v17, 0.0  ;;  %v594_v30 = vmax.f32 %v586_v24, 0.0  ;;  %v589_v31 = vadd.f32 %v588_v27, %v479_v15  ;;  %v2013_v32 = vpop.f32.mrb[3].mxu1  ;;  %v665_v13 = vld [vmem:[#allocation6] sm:$0xf] }
 0x199   : > { %v549_v26 = vadd.f32 %v548_v23, %v475_v14  ;;  %v593_v33 = vmax.f32 %v545_v19, 0.0  ;;  %v681_v14 = vsub.s32 3, %v2788_v8  ;;  %v670_v15 = vrot.slane %v665_v13, %v470_v9 }
 0x19a   : > { %v595_v29 = vmax.f32 %v547_v22, 0.0  ;;  %v597_v36 = vmax.f32 %v589_v31, 0.0  ;;  %v678_v16 = vrot.slane %v665_v13, %v478_v12  ;;  %v674_v17 = vrot.slane %v665_v13, %v474_v11 }
 0x19b   : > { %v596_v34 = vmax.f32 %v549_v26, 0.0 }
 0x19c   : > { %v598_v35 = vpack.c.bf16 %v595_v29, %v592_v28  ;;  %v600_v39 = vpack.c.bf16 %v597_v36, %v594_v30 }
 0x19d   : > { %v599_v37 = vpack.c.bf16 %v596_v34, %v593_v33 }
 0x19f   : > { %1039 = vmatprep.mubr.bf16.mxu0 %v599_v37  ;;  %1082 = vmatprep.mubr.bf16.mxu1 %v599_v37 }
 0x1a0   : > { %1040 = vmatmul.mubr.bf16.vlgmr.msra.gmra.mrb[4].mxu0 %v598_v35  ;;  %1083 = vmatmul.mubr.bf16.vlgmr.msra.gmra.mrb[4].mxu1 %v598_v35 }
 0x1a1   : > { %2015 = vmatpush3.bf16.msra.mxu0 %v2243_v38  ;;  %2030 = vmatprep.mubr.msk.bf16.mxu0 %vm2526_vm0, %v2525_v1 }
 0x1a2   : > { %2016 = vmatprep.subr.bf16.mxu0 %v2525_v1  ;;  %2050 = vmatprep.mubr.msk.bf16.mxu1 %vm2526_vm0, %v2525_v1 }
 0x1a3   : > { %2035 = vmatpush3.bf16.msra.mxu1 %v2266_v62  ;;  %v2286_v62 = vld [vmem:[#allocation10 + $0xa8] sm:$0xff]  }
 0x1a4   : > { %2036 = vmatprep.subr.bf16.mxu1 %v2525_v1 }
 0x1a5   : > { %2017 = vmatpush3.bf16.msra.mxu0 %v2244_v40 }
 0x1a6   : > { %2018 = vmatprep.subr.bf16.mxu0 %v2525_v1 }
 0x1a7   : > { %2037 = vmatpush3.bf16.msra.mxu1 %v2268_v0  ;;  %v2288_v0 = vld [vmem:[#allocation10 + $0xb0] sm:$0xff]  }
 0x1a8   : > { %2038 = vmatprep.subr.bf16.mxu1 %v2525_v1 }
 0x1a9   : > { %2019 = vmatpush3.bf16.msra.mxu0 %v2245_v41 }
 0x1aa   : > { %2020 = vmatprep.subr.bf16.mxu0 %v2525_v1 }
 0x1ab   : > { %2039 = vmatpush3.bf16.msra.mxu1 %v2269_v2  ;;  %v2289_v2 = vld [vmem:[#allocation10 + $0xf8] sm:$0xff]  }
 0x1ac   : > { %2040 = vmatprep.subr.bf16.mxu1 %v2525_v1 }
 0x1ad   : > { %2021 = vmatpush3.bf16.msra.mxu0 %v2246_v42  ;;  %v1892_v42 = vld [vmem:[#allocation9] ss:$0 sm:$0xff] }
 0x1ae   : > { %2022 = vmatprep.subr.bf16.mxu0 %v2525_v1 }
 0x1af   : > { %2041 = vmatpush3.bf16.msra.mxu1 %v2270_v3  ;;  %v2290_v3 = vld [vmem:[#allocation10 + $0xb8] sm:$0xff]  }
 0x1b0   : > { %2042 = vmatprep.subr.bf16.mxu1 %v2525_v1 }
 0x1b1   : > { %2023 = vmatpush3.bf16.msra.mxu0 %v2247_v43 }
 0x1b2   : > { %2024 = vmatprep.subr.bf16.mxu0 %v2525_v1 }
 0x1b3   : > { %2043 = vmatpush3.bf16.msra.mxu1 %v2271_v4 }
 0x1b4   : > { %2044 = vmatprep.subr.bf16.mxu1 %v2525_v1 }
 0x1b5   : > { %2025 = vmatpush3.bf16.msra.mxu0 %v2248_v44 }
 0x1b6   : > { %2026 = vmatprep.subr.bf16.mxu0 %v2525_v1 }
 0x1b7   : > { %2045 = vmatpush3.bf16.msra.mxu1 %v2272_v5 }
 0x1b8   : > { %2046 = vmatprep.subr.bf16.mxu1 %v2525_v1 }
 0x1b9   : > { %2027 = vmatpush3.bf16.msra.mxu0 %v2249_v45 }
 0x1ba   : > { %2028 = vmatprep.subr.bf16.mxu0 %v2525_v1 }
 0x1bb   : > { %2047 = vmatpush3.bf16.msra.mxu1 %v2273_v6 }
 0x1bc   : > { %2048 = vmatprep.subr.bf16.mxu1 %v2525_v1  ;;  %v682_v1 = vrot.slane %v665_v13, %v681_v14 }
 0x1bd   : > { %2029 = vmatpush3.bf16.msra.mxu0 %v2250_v46 }
 0x1be   : > { %1964 = vmatprep.subr.bf16.mxu0 %v2251_v47 }
 0x1bf   : > { %2049 = vmatpush3.bf16.msra.mxu1 %v2274_v7 }
 0x1c0   : > { %2031 = vmatmul.mubr.bf16.vlgmr.msra.gmra.mrb[8].mxu0 %v600_v39  ;;  %1986 = vmatprep.subr.bf16.mxu1 %v2275_v10 }
 0x1c1   : > { %1965 = vmatpush3.bf16.msra.mxu0 %v2252_v48 }
 0x1c2   : > { %1966 = vmatprep.subr.bf16.mxu0 %v2253_v49 }
 0x1c5   : > { %1967 = vmatpush3.bf16.msra.mxu0 %v2254_v50 }
 0x1c6   : > { %1968 = vmatprep.subr.bf16.mxu0 %v2255_v51  ;;  %v2276_v51 = vld [vmem:[#allocation10 + $0x80] sm:$0xff]  }
 0x1c9   : > { %1969 = vmatpush3.bf16.msra.mxu0 %v2256_v52 }
 0x1ca   : > { %1970 = vmatprep.subr.bf16.mxu0 %v2257_v53  ;;  %v2277_v53 = vld [vmem:[#allocation10 + $0xc8] sm:$0xff]  }
 0x1cd   : > { %1971 = vmatpush3.bf16.msra.mxu0 %v2258_v54  ;;  %v2278_v54 = vld [vmem:[#allocation10 + $0x88] sm:$0xff]  }
 0x1ce   : > { %1972 = vmatprep.subr.bf16.mxu0 %v2259_v55  ;;  %v2279_v55 = vld [vmem:[#allocation10 + $0xd0] sm:$0xff]  }
 0x1d1   : > { %1973 = vmatpush3.bf16.msra.mxu0 %v2260_v56  ;;  %v2280_v56 = vld [vmem:[#allocation10 + $0x90] sm:$0xff]  }
 0x1d2   : > { %1974 = vmatprep.subr.bf16.mxu0 %v2261_v57  ;;  %v2281_v57 = vld [vmem:[#allocation10 + $0xd8] sm:$0xff]  }
 0x1d5   : > { %1975 = vmatpush3.bf16.msra.mxu0 %v2262_v58  ;;  %v2282_v58 = vld [vmem:[#allocation10 + $0x98] sm:$0xff]  }
 0x1d6   : > { %1976 = vmatprep.subr.bf16.mxu0 %v2263_v59  ;;  %v2283_v59 = vld [vmem:[#allocation10 + $0xe0] sm:$0xff]  }
 0x1d9   : > { %1977 = vmatpush3.bf16.msra.mxu0 %v2264_v60  ;;  %v2284_v60 = vld [vmem:[#allocation10 + $0xa0] sm:$0xff]  }
 0x1da   : > { %1978 = vmatprep.subr.bf16.mxu0 %v2265_v61  ;;  %v2285_v61 = vld [vmem:[#allocation10 + $0xe8] sm:$0xff]  }
 0x1dd   : > { %1979 = vmatpush3.bf16.msra.mxu0 %v2267_v63  ;;  %v2287_v63 = vld [vmem:[#allocation10 + $0xf0] sm:$0xff]  }
 0x273   : > { %v1041_v18 = vpop.f32.mrb[4].mxu0  ;;  %v1084_v19 = vpop.f32.mrb[4].mxu1 }
 0x274   : > { %v1042_v20 = vadd.f32 %v1041_v18, %v670_v15  ;;  %v1085_v21 = vadd.f32 %v1084_v19, %v678_v16  ;;  %v1043_v22 = vpop.f32.mrb[5].mxu0  ;;  %v1086_v23 = vpop.f32.mrb[5].mxu1 }
 0x275   : > { %v1044_v24 = vadd.f32 %v1043_v22, %v674_v17  ;;  %v1087_v25 = vadd.f32 %v1086_v23, %v682_v1  ;;  %v1045_v26 = vpop.f32.mrb[6].mxu0  ;;  %v1088_v27 = vpop.f32.mrb[6].mxu1  ;;  %v1941_v23 = vld [vmem:[#allocation12] ss:$0 sm:$0xff] }
 0x276   : > { %v1046_v28 = vadd.f32 %v1045_v26, %v670_v15  ;;  %v1089_v29 = vadd.f32 %v1088_v27, %v678_v16  ;;  %v1047_v9 = vpop.f32.mrb[7].mxu0  ;;  %v1090_v30 = vpop.f32.mrb[7].mxu1  ;;  %v1093_v32 = vmax.f32 %v1042_v20, 0.0  ;;  %v1095_v8 = vmax.f32 %v1085_v21, 0.0 }
 0x277   : > { %v1048_v31 = vadd.f32 %v1047_v9, %v674_v17  ;;  %v1091_v12 = vadd.f32 %v1090_v30, %v682_v1  ;;  %v1094_v34 = vmax.f32 %v1044_v24, 0.0  ;;  %v1096_v35 = vmax.f32 %v1087_v25, 0.0 }
 0x278   : > { %v1097_v11 = vmax.f32 %v1046_v28, 0.0  ;;  %v1099_v33 = vmax.f32 %v1089_v29, 0.0 }
 0x279   : > { %v1098_v36 = vmax.f32 %v1048_v31, 0.0  ;;  %v1100_v37 = vmax.f32 %v1091_v12, 0.0 }
 0x27a   : > { %v1215_v38 = vpack.c.bf16 %v1097_v11, %v1093_v32  ;;  %v1217_v39 = vpack.c.bf16 %v1099_v33, %v1095_v8 }
 0x27b   : > { %v1216_v40 = vpack.c.bf16 %v1098_v36, %v1094_v34  ;;  %v1218_v41 = vpack.c.bf16 %v1100_v37, %v1096_v35 }
 0x27d   : > { %1613 = vmatprep.mubr.bf16.mxu0 %v1216_v40 }
 0x27e   : > { %1614 = vmatmul.mubr.bf16.vlgmr.msra.gmra.mrb[12].mxu0 %v1215_v38 }
 0x293   : > { %v1206_v43 = vpop.f32.mrb[8].mxu0 }
 0x294   : > { %v1207_v44 = vadd.f32 %v1892_v42, %v1206_v43  ;;  %v2032_v45 = vpop.f32.mrb[9].mxu0 }
 0x295   : > { %v1209_v46 = vpop.f32.mrb[10].mxu0 }
 0x296   : > { %v1210_v47 = vadd.f32 %v1892_v42, %v1209_v46  ;;  %v2033_v48 = vpop.f32.mrb[11].mxu0  ;;  %v1213_v49 = vmax.f32 %v1207_v44, 0.0 }
 0x298   : > { %v1214_v50 = vmax.f32 %v1210_v47, 0.0 }
 0x29a   : > { %v1283_v52 = vpack.c.bf16 %v1214_v50, %v1213_v49 }
 0x29c   : > { %2051 = vmatmul.mubr.bf16.vlgmr.msra.gmra.mrb[8].mxu1 %v1283_v52 }
 0x29d   : > { %1987 = vmatpush3.bf16.msra.mxu1 %v2276_v51  ;;  %1654 = vmatprep.mubr.bf16.mxu1 %v1218_v41 }
 0x29e   : > { %1988 = vmatprep.subr.bf16.mxu1 %v2277_v53 }
 0x2a1   : > { %1989 = vmatpush3.bf16.msra.mxu1 %v2278_v54 }
 0x2a2   : > { %1990 = vmatprep.subr.bf16.mxu1 %v2279_v55 }
 0x2a5   : > { %1991 = vmatpush3.bf16.msra.mxu1 %v2280_v56 }
 0x2a6   : > { %1992 = vmatprep.subr.bf16.mxu1 %v2281_v57 }
 0x2a9   : > { %1993 = vmatpush3.bf16.msra.mxu1 %v2282_v58 }
 0x2aa   : > { %1994 = vmatprep.subr.bf16.mxu1 %v2283_v59 }
 0x2ad   : > { %1995 = vmatpush3.bf16.msra.mxu1 %v2284_v60 }
 0x2ae   : > { %1996 = vmatprep.subr.bf16.mxu1 %v2285_v61 }
 0x2b1   : > { %1997 = vmatpush3.bf16.msra.mxu1 %v2286_v62 }
 0x2b2   : > { %1998 = vmatprep.subr.bf16.mxu1 %v2287_v63 }
 0x2b5   : > { %1999 = vmatpush3.bf16.msra.mxu1 %v2288_v0 }
 0x2b6   : > { %2000 = vmatprep.subr.bf16.mxu1 %v2289_v2 }
 0x2b9   : > { %2001 = vmatpush3.bf16.msra.mxu1 %v2290_v3 }
 0x2bc   : > { %1655 = vmatmul.mubr.bf16.vlgmr.msra.gmra.mrb[12].mxu1 %v1217_v39 }
 0x351   : > { %v1980_v4 = vpop.f32.mrb[12].mxu0 }
 0x352   : > { %v1981_v5 = vpop.f32.mrb[13].mxu0 }
 0x353   : > { %v1982_v6 = vadd.f32 %v1981_v5, %v1980_v4  ;;  %v1983_v7 = vpop.f32.mrb[14].mxu0 }
 0x354   : > { %v1984_v10 = vpop.f32.mrb[15].mxu0 }
 0x355   : > { %v1985_v13 = vadd.f32 %v1984_v10, %v1983_v7 }
 0x36f   : > { %v1382_v14 = vpop.f32.mrb[8].mxu1 }
 0x370   : > { %v1616_v15 = vadd.f32 %v1982_v6, %v1382_v14  ;;  %v2052_v16 = vpop.f32.mrb[9].mxu1 }
 0x371   : > { %v1385_v17 = vpop.f32.mrb[10].mxu1 }
 0x372   : > { %v1619_v1 = vadd.f32 %v1985_v13, %v1385_v17  ;;  %v2053_v18 = vpop.f32.mrb[11].mxu1 }
 0x38f   : > { %v2002_v19 = vpop.f32.mrb[12].mxu1 }
 0x390   : > { %v2003_v20 = vpop.f32.mrb[13].mxu1 }
 0x391   : > { %v2004_v21 = vadd.f32 %v2003_v20, %v2002_v19  ;;  %v2005_v22 = vpop.f32.mrb[14].mxu1 }
 0x392   : > { %v2006_v24 = vpop.f32.mrb[15].mxu1 }
 0x393   : > { %v1657_v25 = vadd.f32 %v2004_v21, %v1616_v15  ;;  %v2007_v26 = vadd.f32 %v2006_v24, %v2005_v22 }
 0x395   : > { %v1670_v27 = vadd.f32 %v1941_v23, %v1657_v25  ;;  %v1660_v28 = vadd.f32 %v2007_v26, %v1619_v1 }
 0x397   : > { %1672 = vst [vmem:[%s457_s26] sm:$0xff] %v1670_v27  ;;  %v1671_v29 = vadd.f32 %v1941_v23, %v1660_v28 }
 0x399   : > { %1673 = vst [vmem:[%s457_s26 + $0x8] sm:$0xff] %v1671_v29 }
 0x39a PF: > { %s24_s13 = sadd.s32 1, %s2509_s13  }
 0x39b   : > { %p21_p7 = scmp.ge.s32.totalorder %s24_s13, 4  }
 0x39d   :  { %23 = sbr.rel (!%p21_p7) target bundleno = 6 (0x6), region = 119 }
 0x3a4   :  { %1696 = vsyncpa [#allocation3], 1 }
 0x3a5   :  { %1698 = vsyncpa [#allocation3 + $0x1], 1 }
 0x3a6   :  { %1699 = vsyncpa [#allocation5], 1 }
 0x3a7   :  { %1700 = vsyncpa [#allocation8], 1 }
 0x3a8   :  { %1701 = vsyncpa [#allocation11], 1 }

</bundles_post_ra>
